<compile_context>
chip_gen: v7x
topology: tpu7x:2x2x1
jax: 0.10.0
libtpu: 0.0.40
codegen_flags: <defaults>
</compile_context>

<pallas_src>
import jax
import jax.numpy as jnp
from jax.experimental import pallas as pl
from jax.experimental.pallas import tpu as pltpu


def _segment_embedding_kernel(ids_ref, w_ref, out_ref):
    # ids_ref : (TN, 1) int32 in VMEM
    # w_ref   : (V, D)  f32   in VMEM   (resident across the whole grid)
    # out_ref : (TN, D)       in VMEM
    ids = ids_ref[...]                                   # (TN, 1)
    v, d = w_ref.shape
    tn = ids.shape[0]
    # Select chain: exact gather for in-range ids, pure VPU work (1 vsel / row).
    acc = jnp.broadcast_to(w_ref[0:1, :], (tn, d))       # (TN, D)
    for t in range(1, v):                                # V is tiny (e.g. 2)
        acc = jnp.where(ids == t, w_ref[t:t + 1, :], acc)
    out_ref[...] = acc.astype(out_ref.dtype)


def _round_up(x: int, m: int) -> int:
    return ((x + m - 1) // m) * m


def segment_embedding(token_type_ids: jax.Array, weight: jax.Array,
                      *, tile_n: int = 2048, out_dtype=None) -> jax.Array:
    """token_type_ids: (B, S) int; weight: (V, D) -> (B, S, D)."""
    b, s = token_type_ids.shape
    v, d = weight.shape
    n = b * s
    out_dtype = weight.dtype if out_dtype is None else out_dtype
    out_itemsize = jnp.dtype(out_dtype).itemsize

    # --- choose the N tile ---------------------------------------------------
    # ~12 MiB per output buffer (x2 for double buffering) + tiny ids/weight
    # tiles stays inside the explicit 48 MiB VMEM limit on every generation
    # (v7x physical VMEM is only 64 MiB).
    max_out_tile_bytes = 12 * 1024 * 1024
    if n <= 8:
        tn = n                                           # block == full dim: legal
    else:
        tn_cap = max(8, (max_out_tile_bytes // (d * out_itemsize)) // 8 * 8)
        tn = max(8, (min(tile_n, tn_cap) // 8) * 8)
        if pl.cdiv(n, tn) < 2:
            # Split small/medium problems into >= 2 tiles so v7x's two
            # TensorCores both get work along the "parallel" axis.
            tn = max(8, _round_up(pl.cdiv(n, 2), 8))
    grid = (pl.cdiv(n, tn),)

    # --- flatten ids; no padding, no output slicing --------------------------
    ids_2d = token_type_ids.reshape(n, 1).astype(jnp.int32)

    cost = pl.CostEstimate(
        flops=n * d * max(v - 1, 0),                     # selects, advisory only
        transcendentals=0,
        bytes_accessed=n * d * out_itemsize + n * 4 + v * d * weight.dtype.itemsize,
    )

    out_flat = pl.pallas_call(
        _segment_embedding_kernel,
        out_shape=jax.ShapeDtypeStruct((n, d), out_dtype),
        grid_spec=pltpu.PrefetchScalarGridSpec(
            num_scalar_prefetch=0,
            grid=grid,
            in_specs=[
                pl.BlockSpec((tn, 1), lambda i: (i, 0)),   # ids tile
                pl.BlockSpec((v, d), lambda i: (0, 0)),    # resident table
            ],
            out_specs=pl.BlockSpec((tn, d), lambda i: (i, 0)),
        ),
        compiler_params=pltpu.CompilerParams(
            dimension_semantics=("parallel",),             # megacore on v7x
            vmem_limit_bytes=48 << 20,                     # safe on v5e/v6e/v7x
        ),
        cost_estimate=cost,
    )(ids_2d, weight)

    return out_flat.reshape(b, s, d)


if __name__ == "__main__":
    # Deterministic parameter init, mirroring nn.init.normal_(std=0.02).
    type_vocab_size = 2
    d_model = 32
    batch = 2
    seq = 8

    key = jax.random.PRNGKey(0)
    k_w, k_ids = jax.random.split(key)
    weight = 0.02 * jax.random.normal(
        k_w, (type_vocab_size, d_model), dtype=jnp.float32
    )
    token_type_ids = jax.random.randint(
        k_ids, (batch, seq), minval=0, maxval=type_vocab_size, dtype=jnp.int32
    )

    out = segment_embedding(token_type_ids, weight)
    out = jax.block_until_ready(out)

    # Sanity check against plain JAX gather (reference semantics of F.embedding).
    ref = jnp.take(weight, token_type_ids, axis=0)
    assert out.shape == (batch, seq, d_model)
    assert jnp.allclose(out, ref, atol=1e-6), "mismatch vs reference embedding"

    print("KERNEL_OK")
</pallas_src>

<mosaic_0001>
module attributes {stable_mosaic.version = 11 : i64} {
  func.func @_segment_embedding_kernel(%arg0: i32, %arg1: memref<8x1xi32, #tpu.memory_space<vmem>>, %arg2: memref<2x32xf32, #tpu.memory_space<vmem>>, %arg3: memref<8x32xf32, #tpu.memory_space<vmem>>) attributes {dimension_semantics = [#tpu.dimension_semantics<parallel>], iteration_bounds = array<i64: 2>, scalar_prefetch = 0 : i64, scratch_operands = 0 : i64, tpu.core_type = #tpu.core_type<tc>, window_params = [{transform_indices = @transform_0, window_bounds = array<i64: 8, 1>}, {pipeline_mode = #tpu.pipeline_mode<synchronous>, transform_indices = @transform_1, window_bounds = array<i64: 2, 32>}, {transform_indices = @transform_2, window_bounds = array<i64: 8, 32>}]} {
    %c0 = arith.constant 0 : index
    %c0_0 = arith.constant 0 : index
    %0 = vector.load %arg1[%c0, %c0_0] : memref<8x1xi32, #tpu.memory_space<vmem>>, vector<8x1xi32>
    %c0_1 = arith.constant 0 : index
    %c0_2 = arith.constant 0 : index
    %1 = vector.load %arg2[%c0_1, %c0_2] : memref<2x32xf32, #tpu.memory_space<vmem>>, vector<1x32xf32>
    %2 = vector.shape_cast %1 : vector<1x32xf32> to vector<1x32xf32>
    %3 = vector.broadcast %2 : vector<1x32xf32> to vector<8x32xf32>
    %c1_i32 = arith.constant 1 : i32
    %4 = vector.broadcast %c1_i32 : i32 to vector<8x1xi32>
    %5 = arith.cmpi eq, %0, %4 : vector<8x1xi32>
    %c1 = arith.constant 1 : index
    %c0_3 = arith.constant 0 : index
    %6 = vector.load %arg2[%c1, %c0_3] : memref<2x32xf32, #tpu.memory_space<vmem>>, vector<1x32xf32>
    %7 = vector.shape_cast %5 : vector<8x1xi1> to vector<8x1xi1>
    %8 = vector.broadcast %7 : vector<8x1xi1> to vector<8x32xi1>
    %9 = vector.shape_cast %6 : vector<1x32xf32> to vector<1x32xf32>
    %10 = vector.broadcast %9 : vector<1x32xf32> to vector<8x32xf32>
    %11 = arith.select %8, %10, %3 : vector<8x32xi1>, vector<8x32xf32>
    %c0_4 = arith.constant 0 : index
    %c0_5 = arith.constant 0 : index
    %12 = vector.load %arg3[%c0_4, %c0_5] : memref<8x32xf32, #tpu.memory_space<vmem>>, vector<8x32xf32>
    tpu.vector_store %arg3[%c0_4, %c0_5], %11 {strides = array<i32>} : memref<8x32xf32, #tpu.memory_space<vmem>>, vector<8x32xf32>,
    return
  }
  func.func @transform_0(%arg0: i32) -> (i32, i32) {
    %c0_i32 = arith.constant 0 : i32
    %c0_i32_0 = arith.constant 0 : i32
    return %arg0, %c0_i32 : i32, i32
  }
  func.func @transform_1(%arg0: i32) -> (i32, i32) {
    %c0_i32 = arith.constant 0 : i32
    %c0_i32_0 = arith.constant 0 : i32
    %c0_i32_1 = arith.constant 0 : i32
    return %c0_i32, %c0_i32_0 : i32, i32
  }
  func.func @transform_2(%arg0: i32) -> (i32, i32) {
    %c0_i32 = arith.constant 0 : i32
    %c0_i32_0 = arith.constant 0 : i32
    return %arg0, %c0_i32 : i32, i32
  }
}

</mosaic_0001>

<bundles_post_ra>
// kernel: tpu_custom_call.1
= control target key start
LH: loop header
LB: loop body
LE: loop exit
PB: predicated region body
PF: predicated region fallthrough
CT: control target
= control target key end

     0   :  { %7 = vsyncpa [#allocation3], 0  ;;  %s472_s0 = inlined_call_operand.vmem [shape: s32[16,1], index: 0, kind: input, shape index: {}]   ;;  %s473_s1 = inlined_call_operand.vmem [shape: f32[2,32], index: 1, kind: input, shape index: {}]   ;;  %s474_s2 = inlined_call_operand.hbm [shape: f32[16,32], index: 2, kind: output, shape index: {}]  }
   0x1   :  { %9 = vsyncpa [#allocation3 + $0x1], 0  ;;  %s366_s9 = smov 0   ;;  %s368_s10 = smov 0  }
   0x2   :  { %s370_s11 = smov 0   ;;  %s372_s12 = smov 0  }
   0x3 LB: > { %s387_s13 = sadd.s32 4294967295, %s347_s12   ;;  %s232_s14 = sadd.s32 4294967294, %s347_s12   ;;  %s347_s12 = sphi %s372_s12, %s480_s12   ;;  %s343_s11 = sphi %s370_s11, %s479_s11   ;;  %s339_s10 = sphi %s368_s10, %s478_s10   ;;  %s335_s9 = sphi %s366_s9, %s477_s9  }
   0x4   : > { %s391_s15 = sadd.s32 1, %s347_s12   ;;  %s69_s16 = sadd.s32 1, %s343_s11 }
   0x5   : > { %s66_s17 = ssub.s32 %s347_s12, %s391_s15  ;;  %p79_p0 = scmp.ne.s32.totalorder %s343_s11, %s339_s10 }
   0x6   : > { %p67_p1 = scmp.eq.s32.totalorder %s66_s17, 0  ;;  %p80_p2 = scmp.eq.s32.totalorder %s387_s13, 1 }
   0x7   : > { %p85_p3 = scmp.ne.s32.totalorder %s339_s10, %s335_s9  ;;  %p86_p4 = scmp.eq.s32.totalorder %s232_s14, 1 }
   0x8   : > { %s402_s18 = scalar_select %p67_p1, %s343_s11, %s69_s16  }
   0x9   : > { %p404_p5 = por %p80_p2, %p79_p0  ;;  %p408_p6 = por %p86_p4, %p85_p3 }
   0xa   : > { %p235_p7 = scmp.ge.s32.totalorder %s347_s12, 1  ;;  %p114_p8 = scmp.lt.s32.totalorder %s347_s12, 3 }
   0xc   : > { %p115_p9 = pnand %p235_p7, %p114_p8 }
   0xd   : > { %p135_p10 = scmp.lt.s32.totalorder (!%p115_p9), %s387_s13, 1  ;;  %v349_v0 = vmov (!%p115_p9), 0   ;;  %s132_s26 = sand.u32 (!%p115_p9), 1, %s339_s10   ;;  %v238_v3 = vld [vmem:[%s473_s1] ss:$0 sm:$0xff] (!%p115_p9)  ;;  %vm157_vm1 = vcmask (!%p115_p9), 261120  }
   0xe   : > { %118 = sbr.rel (%p115_p9) target bundleno = 172 (0xac), region = 28  ;;  %284 = vset.pattern.permute.xlu0 (!%p115_p9), %v349_v0  ;;  %s236_s27 = sshll.u32 (!%p115_p9), %s132_s26, 3  ;;  %v239_v4 = vld [vmem:[%s473_s1 + $0x1] ss:$0 sm:$0xff] (!%p115_p9) }
   0xf   : > { %s241_s28 = sshll.u32 (!%p115_p9), %s387_s13, 7  ;;  %s134_s29 = scalar_lea.vmem (!%p115_p9), [#allocation2], %s236_s27 }
  0x10   : > { %s173_s30 = sshll.u32 (!%p115_p9), %s134_s29, 4  ;;  %s430_s14 = scalar_lea.hbm (!%p115_p9), %s474_s2, %s241_s28  ;;  %s432_s30 = int_to_ptr.vmem [resolvable:$true] %s173_s30 }
  0x11   : > { %s285_s16 = scalar_lea.vmem (!%p115_p9), %s432_s30, 128  ;;  %s350_s17 = smov (!%p115_p9), [#allocation2]  }
  0x12   : > { %p286_p11 = scmp.ne.s32.totalorder (!%p115_p9), %s432_s30, %s285_s16 }
  0x14   : > { %p287_p12 = pnand (!%p115_p9), %p286_p11, %p404_p5 }
  0x15   : > { %s136_s21 = scalar_select %p135_p10, %s387_s13, 1 }
  0x16   : > { %s160_s13 = scalar_lea.sflag [#allocation3], %s132_s26  ;;  %p288_p13 = pneg %p287_p12 }
  0x17   : > { %s237_s22 = sshll.u32 %s136_s21, 3  ;;  %s289_s21 = sshll.u32 %s350_s17, 4  ;;  %s290_s21 = int_to_ptr.vmem [resolvable:$false] %s289_s21 }
  0x18   : > { %s138_s25 = scalar_lea.vmem %s472_s0, %s237_s22  ;;  %s291_s22 = scalar_lea.vmem %s290_s21, 256 }
  0x19   : > { %v139_v1 = vld [vmem:[%s138_s25] sm:$0xff]  ;;  %p292_p0 = scmp.lt.s32.totalorder %s432_s30, %s290_s21  ;;  %p293_p1 = scmp.lt.s32.totalorder %s291_s22, %s285_s16 }
  0x1a   : > { %vm145_vm0 = vcmp.eq.s32.totalorder %v139_v1, 1 }
  0x1b   : > { %v147_v2 = vsel %vm145_vm0, 1, %v349_v0  ;;  %p294_p2 = por %p293_p1, %p292_p0 }
  0x1c   : > { %149 = vperm.xlu0 %284, %v147_v2  }
  0x1d   : > { %p295_p3 = pnand %p294_p2, %p288_p13 }
  0x9b   : > { %v150_v5 = vpop.permute.xlu0 %149 }
  0x9c   : > { %vm151_vm2 = vcmp.eq.s32.totalorder %v150_v5, 1 }
  0x9d   : > { %v156_v6 = vsel %vm151_vm2, %v239_v4, %v238_v3 }
  0x9e   : > { %158 = vst.msk [vmem:[%s134_s29] sm:$0xff] %vm157_vm1, %v156_v6 }
  0x9f   : > { %298 = shalt.err (!%p295_p3)
}
  0xa0   : > { %s299_s23 = scalar_lea.hbm %s430_s14, 128  ;;  %s303_s26 = scalar_lea.hbm %s474_s2, 256 }
  0xa1   : > { %p300_p4 = scmp.ne.s32.totalorder %s430_s14, %s299_s23  ;;  %p304_p9 = scmp.lt.u32.totalorder %s430_s14, %s474_s2 }
  0xa2   : > { %p305_p10 = scmp.lt.u32.totalorder %s303_s26, %s299_s23  ;;  %p307_p12 = scmp.lt.u32.totalorder %s299_s23, %s430_s14 }
  0xa3   : > { %p301_p7 = pnand %p300_p4, %p404_p5 }
  0xa4   : > { %p306_p11 = por %p305_p10, %p304_p9 }
  0xa5   : > { %p302_p8 = pneg %p301_p7 }
  0xa6   : > { %p308_p13 = por %p307_p12, %p306_p11 }
  0xa8   : > { %p309_p0 = pnand %p308_p13, %p302_p8 }
  0xaa   : > { %312 = shalt.err (!%p309_p0)
}
  0xab   : > { %244 = dma.vmem_to_hbm [thread:$0]  (%p404_p5), %s432_s30, 128, %s430_s14, %s160_s13  }
  0xac PF: > { %p250_p1 = scmp.ge.s32.totalorder %s347_s12, 2  ;;  %s185_s29 = sand.u32 1, %s335_s9  }
  0xad   : > { %s186_s3 = scalar_lea.sflag [#allocation3], %s185_s29 }
  0xae   : > { %p247_p2 = pnand %p250_p1, %p408_p6 }
  0xb0   : > { %330 = dma.done.wait (!%p247_p2), %s186_s3, 128  }
  0xb1   : > { %332 = vsyncadd (!%p247_p2), %s186_s3, 4294967168  ;;  %p12_p3 = scmp.ge.s32.totalorder %s391_s15, 4   ;;  %s477_s9 = smov %s339_s10 }
  0xb2   : > { %s478_s10 = smov %s343_s11  ;;  %s479_s11 = smov %s402_s18 }
  0xb3   : > { %s480_s12 = smov %s391_s15  ;;  %14 = sbr.rel (!%p12_p3) target bundleno = 3 (0x3), region = 63 }
  0xba   :  { %191 = vsyncpa [#allocation3], 1 }
  0xbb   :  { %193 = vsyncpa [#allocation3 + $0x1], 1 }

</bundles_post_ra>
